<compile_context>
chip_gen: v7x
topology: tpu7x:2x2x1
jax: 0.10.0
libtpu: 0.0.40
codegen_flags: <defaults>
</compile_context>

<pallas_src>
import jax
import jax.numpy as jnp
from jax.experimental import pallas as pl
from jax.experimental.pallas import tpu as pltpu

NEG_SLOPE = 0.01          # nn.LeakyReLU default slope

_VMEM_TILE_BUDGET = 16 << 20   # bytes of VMEM for double-buffered tiles (all gens)
_LANE_TILE_CAP = 8192          # max batch columns per tile
_SMALL_BATCH = 512             # below this, plain XLA beats the custom-call overhead


# ----------------------------------------------------------------------------
# Kernel:  y^T = LeakyReLU(W_aug^T @ x_aug^T)      (bias folded into the matmul)
#   w_ref: (act, K)  resident folded weights (K = in_dim + 1)
#   x_ref: (K, TB)   activation columns, batch on the lane axis
#   o_ref: (act, TB) lane-dense output tile
# ----------------------------------------------------------------------------
def idm_kernel(w_ref, x_ref, o_ref):
    y = jnp.dot(w_ref[...], x_ref[...], preferred_element_type=jnp.float32)
    o_ref[...] = jnp.where(y >= 0, y, NEG_SLOPE * y)


# ----------------------------------------------------------------------------
# Parameter construction (PyTorch-default-style uniform ranges)
# ----------------------------------------------------------------------------
def init_params(key, in_dim, action_size):
    """Deterministic synthetic params mirroring the PyTorch module."""
    out = max(8, in_dim)
    qk = max(1, out // 8)   # Conv1d(out, out//8, 1) — dead path, kept for the reference
    ks = jax.random.split(key, 10)

    def lin(k, fan_in, shape):
        bound = 1.0 / jnp.sqrt(fan_in)
        return jax.random.uniform(k, shape, jnp.float32, -bound, bound)

    return {
        "w1": lin(ks[0], in_dim, (out, in_dim)),   "b1": lin(ks[1], in_dim, (out,)),
        "wq": lin(ks[2], out, (qk, out)),          "bq": lin(ks[3], out, (qk,)),
        "wk": lin(ks[4], out, (qk, out)),          "bk": lin(ks[5], out, (qk,)),
        "wv": lin(ks[6], out, (out, out)),         "bv": lin(ks[7], out, (out,)),
        # torch inits gamma to 0; use a nonzero value so the value/residual path matters.
        "gamma": jnp.array([[0.1]], dtype=jnp.float32),
        "w2": lin(ks[8], out, (action_size, out)), "b2": lin(ks[9], out, (action_size,)),
    }


def prepare_params(params, *, mxu_dtype=jnp.float32):
    """Fold the whole linear chain into one affine map (run once per weight update).

      h      = x @ W1^T + b1
      h'     = gamma*(h @ Wv^T + bv) + h = h @ M + gamma*bv,   M = I + gamma*Wv^T
      y_pre  = h' @ W2^T + b2
             = x @ (W1^T @ M @ W2^T) + ((b1 @ M + gamma*bv) @ W2^T + b2)

    NOTE: forward/inference-only — re-run after every weight update.
    """
    gamma = params["gamma"][0, 0]
    out = params["w1"].shape[0]
    m = jnp.eye(out, dtype=jnp.float32) + gamma * params["wv"].T          # (out, out)
    w_eff = params["w1"].T @ m @ params["w2"].T                           # (in_dim, act)
    b_eff = (params["b1"] @ m + gamma * params["bv"]) @ params["w2"].T + params["b2"]
    # Augmented weights: bias appended as an extra row, pre-transposed for the
    # lane-dense (batch-on-lanes) kernel layout.
    w_aug_t = jnp.concatenate([w_eff, b_eff[None, :]], axis=0).T          # (act, in_dim+1)
    return {
        "w_eff": w_eff.astype(jnp.float32),
        "b_eff": b_eff.astype(jnp.float32),
        "w_aug_t": w_aug_t.astype(mxu_dtype),   # bf16 here for the v6e/v7x MXU fast path
    }


# ----------------------------------------------------------------------------
# Tiling
# ----------------------------------------------------------------------------
def _round_up(x, m):
    return pl.cdiv(x, m) * m


def _pick_lane_tile(batch, k_dim, act):
    """Batch tile along the lane axis: multiple of 128, VMEM-budgeted, and small
    enough that large batches always produce >= 2 grid steps (v7x megacore)."""
    if batch < 256:
        return batch                            # single full block (always legal)
    bytes_per_col = 4 * 2 * (k_dim + act)       # double-buffered f32 x-tile + out-tile
    tb = min(_LANE_TILE_CAP, _VMEM_TILE_BUDGET // bytes_per_col)
    tb = min(tb, _round_up(batch, 256) // 2)    # guarantee >= 2 grid steps
    return max(128, (tb // 128) * 128)


# ----------------------------------------------------------------------------
# Wrapper
# ----------------------------------------------------------------------------
def idm_forward(state, nstate, prepared, *, force_pallas=False):
    state = state.astype(jnp.float32)           # mirrors x.float()
    nstate = nstate.astype(jnp.float32)
    batch = state.shape[0]
    act = prepared["w_eff"].shape[1]

    # Small-batch fast path: XLA's fused dot+select beats the custom-call
    # launch + DMA latency at tiny sizes on every TPU generation.
    if batch < _SMALL_BATCH and not force_pallas:
        x = jnp.concatenate([state, nstate], axis=1)
        y = x @ prepared["w_eff"] + prepared["b_eff"]
        return jnp.where(y >= 0, y, NEG_SLOPE * y)

    w_aug_t = prepared["w_aug_t"]               # (act, K), K = in_dim + 1
    k_dim = w_aug_t.shape[1]

    # Lane-dense transposed layout: batch -> lanes; bias folded via a ones row.
    xt = jnp.concatenate(
        [state.T, nstate.T, jnp.ones((1, batch), jnp.float32)], axis=0
    ).astype(w_aug_t.dtype)                     # (K, B)

    tb = _pick_lane_tile(batch, k_dim, act)
    b_pad = _round_up(batch, tb)
    if b_pad != batch:
        xt = jnp.pad(xt, ((0, 0), (0, b_pad - batch)))

    yt = pl.pallas_call(
        idm_kernel,
        out_shape=jax.ShapeDtypeStruct((act, b_pad), jnp.float32),
        grid_spec=pltpu.PrefetchScalarGridSpec(
            num_scalar_prefetch=0,
            grid=(b_pad // tb,),
            in_specs=[
                pl.BlockSpec((act, k_dim), lambda i: (0, 0)),   # resident folded weights
                pl.BlockSpec((k_dim, tb), lambda i: (0, i)),    # activation columns
            ],
            out_specs=pl.BlockSpec((act, tb), lambda i: (0, i)),
        ),
        compiler_params=pltpu.CompilerParams(
            dimension_semantics=("parallel",),   # shards batch tiles across v7x's 2 TCs
            vmem_limit_bytes=32 << 20,
        ),
    )(w_aug_t, xt)

    return yt[:, :batch].T                      # back to (B, act)


# ----------------------------------------------------------------------------
# Pure-JAX reference mirroring the UNFOLDED PyTorch forward (incl. dead softmax)
# ----------------------------------------------------------------------------
def idm_reference(state, nstate, params):
    x = jnp.concatenate([state, nstate], axis=1).astype(jnp.float32)
    h = x @ params["w1"].T + params["b1"]
    q = h @ params["wq"].T + params["bq"]       # (B, 1)
    k = h @ params["wk"].T + params["bk"]       # (B, 1)
    v = h @ params["wv"].T + params["bv"]       # (B, C)
    energy = q * k
    attn = jax.nn.softmax(energy, axis=-1)      # size-1 axis -> ones
    out = v * attn
    attn_out = params["gamma"][0, 0] * out + h
    y = attn_out @ params["w2"].T + params["b2"]
    return jnp.where(y >= 0, y, NEG_SLOPE * y)


if __name__ == "__main__":
    key = jax.random.PRNGKey(0)
    k_s, k_n, k_p, k_s2, k_n2 = jax.random.split(key, 5)

    # IDM(action_size=4, input=8): state/nState each have 4 features.
    half, action_size = 4, 4
    params = init_params(k_p, in_dim=2 * half, action_size=action_size)
    prepared = prepare_params(params)           # once per weight update

    # --- shipped tiny shape (B=2): fast path AND forced Pallas path ---------
    B = 2
    state = jax.random.normal(k_s, (B, half), jnp.float32)
    nstate = jax.random.normal(k_n, (B, half), jnp.float32)
    ref = idm_reference(state, nstate, params)

    out_fast = jax.block_until_ready(idm_forward(state, nstate, prepared))
    out_pallas = jax.block_until_ready(
        idm_forward(state, nstate, prepared, force_pallas=True))
    assert out_fast.shape == (B, action_size)
    assert out_pallas.shape == (B, action_size)
    assert jnp.allclose(out_fast, ref, atol=1e-5, rtol=1e-5), (out_fast, ref)
    assert jnp.allclose(out_pallas, ref, atol=1e-5, rtol=1e-5), (out_pallas, ref)

    # --- ragged larger batch: exercises lane tiling, padding, 2 grid steps ---
    B2 = 770
    state2 = jax.random.normal(k_s2, (B2, half), jnp.float32)
    nstate2 = jax.random.normal(k_n2, (B2, half), jnp.float32)
    out2 = jax.block_until_ready(idm_forward(state2, nstate2, prepared))
    ref2 = idm_reference(state2, nstate2, params)
    assert out2.shape == (B2, action_size)
    assert jnp.allclose(out2, ref2, atol=1e-5, rtol=1e-5)

    print("KERNEL_OK")
</pallas_src>

<mosaic_0001>
module attributes {stable_mosaic.version = 11 : i64} {
  func.func @idm_kernel(%arg0: i32, %arg1: memref<4x9xf32, #tpu.memory_space<vmem>>, %arg2: memref<9x2xf32, #tpu.memory_space<vmem>>, %arg3: memref<4x2xf32, #tpu.memory_space<vmem>>) attributes {dimension_semantics = [#tpu.dimension_semantics<parallel>], iteration_bounds = array<i64: 1>, scalar_prefetch = 0 : i64, scratch_operands = 0 : i64, tpu.core_type = #tpu.core_type<tc>, window_params = [{pipeline_mode = #tpu.pipeline_mode<synchronous>, transform_indices = @transform_0, window_bounds = array<i64: 4, 9>}, {transform_indices = @transform_1, window_bounds = array<i64: 9, 2>}, {transform_indices = @transform_2, window_bounds = array<i64: 4, 2>}]} {
    %c0 = arith.constant 0 : index
    %c0_0 = arith.constant 0 : index
    %0 = vector.load %arg1[%c0, %c0_0] : memref<4x9xf32, #tpu.memory_space<vmem>>, vector<4x9xf32>
    %c0_1 = arith.constant 0 : index
    %c0_2 = arith.constant 0 : index
    %1 = vector.load %arg2[%c0_1, %c0_2] : memref<9x2xf32, #tpu.memory_space<vmem>>, vector<9x2xf32>
    %cst = arith.constant dense<0.000000e+00> : vector<4x2xf32>
    %2 = tpu.matmul %0, %1, %cst {dimension_numbers = #tpu.dot_dimension_numbers<[1], [0], [0], [1], [0, 0, 1, 1], [], []>} : vector<4x9xf32>, vector<9x2xf32>, vector<4x2xf32> -> vector<4x2xf32>
    %cst_3 = arith.constant 0.000000e+00 : f32
    %3 = vector.broadcast %cst_3 : f32 to vector<4x2xf32>
    %4 = arith.cmpf oge, %2, %3 : vector<4x2xf32>
    %cst_4 = arith.constant 0.00999999977 : f32
    %5 = vector.broadcast %cst_4 : f32 to vector<4x2xf32>
    %6 = arith.mulf %5, %2 : vector<4x2xf32>
    %7 = arith.select %4, %2, %6 : vector<4x2xi1>, vector<4x2xf32>
    %c0_5 = arith.constant 0 : index
    %c0_6 = arith.constant 0 : index
    %8 = vector.load %arg3[%c0_5, %c0_6] : memref<4x2xf32, #tpu.memory_space<vmem>>, vector<4x2xf32>
    tpu.vector_store %arg3[%c0_5, %c0_6], %7 {strides = array<i32>} : memref<4x2xf32, #tpu.memory_space<vmem>>, vector<4x2xf32>,
    return
  }
  func.func @transform_0(%arg0: i32) -> (i32, i32) {
    %c0_i32 = arith.constant 0 : i32
    %c0_i32_0 = arith.constant 0 : i32
    %c0_i32_1 = arith.constant 0 : i32
    return %c0_i32, %c0_i32_0 : i32, i32
  }
  func.func @transform_1(%arg0: i32) -> (i32, i32) {
    %c0_i32 = arith.constant 0 : i32
    %c0_i32_0 = arith.constant 0 : i32
    return %c0_i32, %arg0 : i32, i32
  }
  func.func @transform_2(%arg0: i32) -> (i32, i32) {
    %c0_i32 = arith.constant 0 : i32
    %c0_i32_0 = arith.constant 0 : i32
    return %c0_i32, %arg0 : i32, i32
  }
}

</mosaic_0001>

<bundles_post_ra>
// kernel: tpu_custom_call.1
= control target key start
LH: loop header
LB: loop body
LE: loop exit
PB: predicated region body
PF: predicated region fallthrough
CT: control target
= control target key end

     0   :  { %vm18_vm0 = vcmask 1040384   ;;  %v121_v0 = vmov 0.0|0.0   ;;  %vm122_vm1 = vmmov 1   ;;  %vm123_vm3 = vmmov 0   ;;  %s152_s1 = inlined_call_operand.vmem [shape: f32[9,2], index: 1, kind: input, shape index: {}]   ;;  %s153_s0 = inlined_call_operand.vmem [shape: f32[4,9], index: 0, kind: input, shape index: {}]   ;;  %s154_s2 = inlined_call_operand.vmem [shape: f32[4,2], index: 2, kind: output, shape index: {}]  }
   0x1   :  { %113 = vmatprep.subr.bf16.mxu0 %v121_v0  ;;  %v12_v1 = vld [vmem:[%s152_s1] sm:$0xff]  ;;  %v13_v2 = vld [vmem:[%s152_s1 + $0x8] sm:$0x1]  ;;  %vm115_vm2 = vmpackc.low %vm18_vm0, %vm122_vm1  ;;  %v124_v4 = vmov 0.0   ;;  %vm14_vm4 = vcmask 72704   ;;  %vm95_vm6 = vcmask 11264  }
   0x2   :  { %v114_v3 = vpack.c.bf16 %v13_v2, %v12_v1  ;;  %110 = vmatprep.mubr.msk.f32.mxu0 %vm123_vm3, %v124_v4  ;;  %v11_v5 = vld [vmem:[%s153_s0] sm:$0xf] }
   0x4   :  { %116 = vmatpush3.bf16.msk.msra.mxu0 %vm115_vm2, %v114_v3 }
   0x7   :  { %111 = vmatmul.mubr.msk.f32.vlgmr.msra.gmra.mrb[0].mxu0 %vm14_vm4, %v11_v5 }
  0xda   :  { %v88_v6 = vpop.f32.mrb[0].mxu0 }
  0xdb   :  { %vm92_vm5 = vcmp.ge.f32.partialorder %v88_v6, 0.0  ;;  %v93_v7 = vmul.f32 0.01, %v88_v6  ;;  %v112_v8 = vpop.f32.mrb[1].mxu0 }
  0xdd   :  { %v94_v9 = vsel %vm92_vm5, %v88_v6, %v93_v7 }
  0xde   :  { %96 = vst.msk [vmem:[%s154_s2] sm:$0xf] %vm95_vm6, %v94_v9 }

</bundles_post_ra>
